<compile_context>
chip_gen: v7x
topology: tpu7x:2x2x1
jax: 0.10.0
libtpu: 0.0.40
codegen_flags: <defaults>
</compile_context>

<pallas_src>
import functools
import math

import jax
import jax.numpy as jnp
import numpy as np
from jax.experimental import pallas as pl
from jax.experimental.pallas import tpu as pltpu


def _mha_kernel(x_ref, mask_ref, wqkv_ref, bqkv_ref, wp_ref, bp_ref, o_ref,
                *, n_head):
    """One grid step = Bb batch elements. x_ref: (Bb, T, E) bf16,
    mask_ref: (Bb, 1, T) f32 additive bias, wqkv: (E, 3E) bf16, bqkv: (1, 3E) f32,
    wp: (E, E) bf16 (pre-transposed), bp: (1, E) f32, o_ref: (Bb, T, E) f32."""
    Bb, T, E = x_ref.shape
    H = n_head
    Dh = E // H

    # Fold batch into rows for the projections (leading-dim reshape: no
    # lane-layout change, T is sublane-aligned).
    x = x_ref[...].reshape(Bb * T, E)                      # bf16

    # Fused QKV projection: one MXU matmul, f32 accumulate.
    qkv = jnp.dot(x, wqkv_ref[...], preferred_element_type=jnp.float32)
    qkv = qkv + bqkv_ref[...]                              # (Bb*T, 3E) f32

    scale = 1.0 / math.sqrt(Dh)
    # Fold the 1/sqrt(Dh) scale into q once (instead of scaling (T,T) per head).
    q = (qkv[:, :E] * scale).reshape(Bb, T, E).astype(jnp.bfloat16)
    k = qkv[:, E:2 * E].reshape(Bb, T, E).astype(jnp.bfloat16)
    v = qkv[:, 2 * E:].reshape(Bb, T, E).astype(jnp.bfloat16)

    # Hoist the mask broadcast out of the head loop (single broadcast_in_dim).
    mask_b = jnp.broadcast_to(mask_ref[...], (Bb, T, T))   # f32, -1e30 on padded keys

    wp = wp_ref[...]                                       # (E, E) bf16

    acc = jnp.zeros((Bb * T, E), jnp.float32)
    # Small static head count -> unrolled loop; output projection is fused per
    # head so no concatenate and no n_head-wide live set of head outputs.
    for h in range(H):
        sl = slice(h * Dh, (h + 1) * Dh)
        qh, kh, vh = q[:, :, sl], k[:, :, sl], v[:, :, sl]     # (Bb, T, Dh) bf16

        s = jnp.einsum("bqd,bkd->bqk", qh, kh,
                       preferred_element_type=jnp.float32) + mask_b   # (Bb, T, T) f32
        s = s - jnp.max(s, axis=-1, keepdims=True)        # stable softmax, f32
        p = jnp.exp(s)
        denom = jnp.sum(p, axis=-1, keepdims=True)
        p = p * pl.reciprocal(denom, approx=True)

        ctx = jnp.einsum("bqk,bkd->bqd", p.astype(jnp.bfloat16), vh,
                         preferred_element_type=jnp.float32)          # (Bb, T, Dh)

        # Fused output projection for this head's block of wp rows.
        acc = acc + jnp.dot(ctx.reshape(Bb * T, Dh).astype(jnp.bfloat16),
                            wp[sl, :],
                            preferred_element_type=jnp.float32)

    out = acc + bp_ref[...]                                # (Bb*T, E) f32
    o_ref[...] = out.reshape(Bb, T, E).astype(o_ref.dtype)


def multi_head_attention(x, padding_mask, params, *, n_head, batch_block=8):
    """x: (B, T, E) float32; padding_mask: (B, T) bool (True = padded key)."""
    B, T, E = x.shape
    assert E % n_head == 0
    wq, bq, wk, bk, wv, bv, wp, bp = params

    # Fuse the three projections (boundary-time concat on tiny weights).
    wqkv = jnp.concatenate([wq, wk, wv], axis=1).astype(jnp.bfloat16)   # (E, 3E)
    bqkv = jnp.concatenate([bq, bk, bv], axis=1).astype(jnp.float32)    # (1, 3E)
    wp_b = wp.astype(jnp.bfloat16)
    bp_f = bp.astype(jnp.float32)

    # Additive key-padding bias; large finite negative avoids NaN on fully
    # padded rows (unlike -inf with max-subtraction).
    mask_bias = jnp.where(padding_mask, -1e30, 0.0).astype(jnp.float32)
    mask_bias = mask_bias.reshape(B, 1, T)

    x_b = x.astype(jnp.bfloat16)

    Bb = min(B, batch_block)
    assert B % Bb == 0, "batch must be divisible by the batch block"
    grid = (B // Bb,)

    kernel = functools.partial(_mha_kernel, n_head=n_head)

    grid_spec = pltpu.PrefetchScalarGridSpec(
        num_scalar_prefetch=0,
        grid=grid,
        in_specs=[
            pl.BlockSpec((Bb, T, E), lambda b: (b, 0, 0)),      # x (bf16)
            pl.BlockSpec((Bb, 1, T), lambda b: (b, 0, 0)),      # additive mask bias
            pl.BlockSpec((E, 3 * E), lambda b: (0, 0)),         # fused Wqkv (bf16)
            pl.BlockSpec((1, 3 * E), lambda b: (0, 0)),         # fused bqkv (f32)
            pl.BlockSpec((E, E), lambda b: (0, 0)),             # c_proj weight (bf16, pre-transposed)
            pl.BlockSpec((1, E), lambda b: (0, 0)),             # c_proj bias (f32)
        ],
        out_specs=pl.BlockSpec((Bb, T, E), lambda b: (b, 0, 0)),
    )

    return pl.pallas_call(
        kernel,
        out_shape=jax.ShapeDtypeStruct((B, T, E), jnp.float32),
        grid_spec=grid_spec,
        compiler_params=pltpu.CompilerParams(dimension_semantics=("parallel",)),
    )(x_b, mask_bias, wqkv, bqkv, wp_b, bp_f)


def reference_mha(x, padding_mask, params, *, n_head):
    """Pure-JAX f32 reference mirroring the PyTorch forward (eval mode)."""
    wq, bq, wk, bk, wv, bv, wp, bp = params
    B, T, E = x.shape
    Dh = E // n_head
    q = x @ wq + bq[0]
    k = x @ wk + bk[0]
    v = x @ wv + bv[0]
    outs = []
    for h in range(n_head):
        qh, kh, vh = (a[..., h * Dh:(h + 1) * Dh] for a in (q, k, v))
        att = jnp.einsum("btd,bsd->bts", qh, kh) / math.sqrt(Dh)
        att = jnp.where(padding_mask[:, None, :], -jnp.inf, att)
        att = jax.nn.softmax(att, axis=-1)
        outs.append(jnp.einsum("bts,bsd->btd", att, vh))
    y = jnp.concatenate(outs, axis=-1)
    return y @ wp + bp[0]


def init_params(key, n_embd, n_head):
    """Deterministic parameter init (PyTorch-Linear-like uniform bounds).
    Per-head Linear(n_embd, n_embd_head) weights are stacked column-wise into
    (E, E) matrices already transposed for x @ W use."""
    Dh = n_embd // n_head
    keys = jax.random.split(key, 8)
    bound_h = 1.0 / math.sqrt(n_embd)

    def u(k, shape, bound):
        return jax.random.uniform(k, shape, jnp.float32, -bound, bound)

    wq = u(keys[0], (n_embd, n_head * Dh), bound_h)
    bq = u(keys[1], (1, n_head * Dh), bound_h)
    wk = u(keys[2], (n_embd, n_head * Dh), bound_h)
    bk = u(keys[3], (1, n_head * Dh), bound_h)
    wv = u(keys[4], (n_embd, n_head * Dh), bound_h)
    bv = u(keys[5], (1, n_head * Dh), bound_h)
    # c_proj: Linear(n_embd, n_embd); stored pre-transposed so y @ wp == y @ W.T
    wp = u(keys[6], (n_embd, n_embd), bound_h)
    bp = u(keys[7], (1, n_embd), bound_h)
    return (wq, bq, wk, bk, wv, bv, wp, bp)


if __name__ == "__main__":
    B, T, n_embd, n_head = 2, 8, 32, 4

    key = jax.random.PRNGKey(0)
    kx, kp = jax.random.split(key, 2)

    x = jax.random.normal(kx, (B, T, n_embd), dtype=jnp.float32)
    params = init_params(kp, n_embd, n_head)
    # padding mask: last 2 positions of batch 0 and last 3 of batch 1 are padded
    padding_mask = jnp.array(
        [[False] * 6 + [True] * 2,
         [False] * 5 + [True] * 3],
        dtype=jnp.bool_,
    )

    out = multi_head_attention(x, padding_mask, params, n_head=n_head)
    out = jax.block_until_ready(out)

    ref = reference_mha(x, padding_mask, params, n_head=n_head)
    # Tolerance reflects bf16 MXU inputs in the kernel vs. the f32 reference.
    np.testing.assert_allclose(np.asarray(out), np.asarray(ref), atol=5e-2, rtol=5e-2)

    print("KERNEL_OK")
</pallas_src>

<mosaic_0001>
module attributes {stable_mosaic.version = 11 : i64} {
  func.func @_mha_kernel(%arg0: i32, %arg1: memref<2x8x32xbf16, #tpu.memory_space<vmem>>, %arg2: memref<2x1x8xf32, #tpu.memory_space<vmem>>, %arg3: memref<32x96xbf16, #tpu.memory_space<vmem>>, %arg4: memref<1x96xf32, #tpu.memory_space<vmem>>, %arg5: memref<32x32xbf16, #tpu.memory_space<vmem>>, %arg6: memref<1x32xf32, #tpu.memory_space<vmem>>, %arg7: memref<2x8x32xf32, #tpu.memory_space<vmem>>) attributes {dimension_semantics = [#tpu.dimension_semantics<parallel>], iteration_bounds = array<i64: 1>, scalar_prefetch = 0 : i64, scratch_operands = 0 : i64, tpu.core_type = #tpu.core_type<tc>, window_params = [{transform_indices = @transform_0, window_bounds = array<i64: 2, 8, 32>}, {transform_indices = @transform_1, window_bounds = array<i64: 2, 1, 8>}, {pipeline_mode = #tpu.pipeline_mode<synchronous>, transform_indices = @transform_2, window_bounds = array<i64: 32, 96>}, {pipeline_mode = #tpu.pipeline_mode<synchronous>, transform_indices = @transform_3, window_bounds = array<i64: 1, 96>}, {pipeline_mode = #tpu.pipeline_mode<synchronous>, transform_indices = @transform_4, window_bounds = array<i64: 32, 32>}, {pipeline_mode = #tpu.pipeline_mode<synchronous>, transform_indices = @transform_5, window_bounds = array<i64: 1, 32>}, {transform_indices = @transform_6, window_bounds = array<i64: 2, 8, 32>}]} {
    %c0 = arith.constant 0 : index
    %c0_0 = arith.constant 0 : index
    %c0_1 = arith.constant 0 : index
    %0 = vector.load %arg1[%c0, %c0_0, %c0_1] : memref<2x8x32xbf16, #tpu.memory_space<vmem>>, vector<2x8x32xbf16>
    %1 = vector.shape_cast %0 : vector<2x8x32xbf16> to vector<16x32xbf16>
    %c0_2 = arith.constant 0 : index
    %c0_3 = arith.constant 0 : index
    %2 = vector.load %arg3[%c0_2, %c0_3] : memref<32x96xbf16, #tpu.memory_space<vmem>>, vector<32x96xbf16>
    %cst = arith.constant dense<0.000000e+00> : vector<16x96xf32>
    %3 = tpu.matmul %1, %2, %cst {dimension_numbers = #tpu.dot_dimension_numbers<[1], [0], [0], [1], [0, 0, 1, 1], [], []>} : vector<16x32xbf16>, vector<32x96xbf16>, vector<16x96xf32> -> vector<16x96xf32>
    %c0_4 = arith.constant 0 : index
    %c0_5 = arith.constant 0 : index
    %4 = vector.load %arg4[%c0_4, %c0_5] : memref<1x96xf32, #tpu.memory_space<vmem>>, vector<1x96xf32>
    %5 = vector.broadcast %4 : vector<1x96xf32> to vector<16x96xf32>
    %6 = arith.addf %3, %5 : vector<16x96xf32>
    %7 = vector.extract_strided_slice %6 {offsets = [0, 0], sizes = [16, 32], strides = [1, 1]} : vector<16x96xf32> to vector<16x32xf32>
    %cst_6 = arith.constant 0.353553385 : f32
    %8 = vector.broadcast %cst_6 : f32 to vector<16x32xf32>
    %9 = arith.mulf %7, %8 : vector<16x32xf32>
    %10 = vector.shape_cast %9 : vector<16x32xf32> to vector<2x8x32xf32>
    %11 = arith.truncf %10 : vector<2x8x32xf32> to vector<2x8x32xbf16>
    %12 = vector.extract_strided_slice %6 {offsets = [0, 32], sizes = [16, 32], strides = [1, 1]} : vector<16x96xf32> to vector<16x32xf32>
    %13 = vector.shape_cast %12 : vector<16x32xf32> to vector<2x8x32xf32>
    %14 = arith.truncf %13 : vector<2x8x32xf32> to vector<2x8x32xbf16>
    %15 = vector.extract_strided_slice %6 {offsets = [0, 64], sizes = [16, 32], strides = [1, 1]} : vector<16x96xf32> to vector<16x32xf32>
    %16 = vector.shape_cast %15 : vector<16x32xf32> to vector<2x8x32xf32>
    %17 = arith.truncf %16 : vector<2x8x32xf32> to vector<2x8x32xbf16>
    %c0_7 = arith.constant 0 : index
    %c0_8 = arith.constant 0 : index
    %c0_9 = arith.constant 0 : index
    %18 = vector.load %arg2[%c0_7, %c0_8, %c0_9] : memref<2x1x8xf32, #tpu.memory_space<vmem>>, vector<2x1x8xf32>
    %19 = vector.shape_cast %18 : vector<2x1x8xf32> to vector<2x1x8xf32>
    %20 = vector.broadcast %19 : vector<2x1x8xf32> to vector<2x8x8xf32>
    %c0_10 = arith.constant 0 : index
    %c0_11 = arith.constant 0 : index
    %21 = vector.load %arg5[%c0_10, %c0_11] : memref<32x32xbf16, #tpu.memory_space<vmem>>, vector<32x32xbf16>
    %cst_12 = arith.constant 0.000000e+00 : f32
    %22 = vector.broadcast %cst_12 : f32 to vector<16x32xf32>
    %23 = vector.extract_strided_slice %11 {offsets = [0, 0, 0], sizes = [2, 8, 8], strides = [1, 1, 1]} : vector<2x8x32xbf16> to vector<2x8x8xbf16>
    %24 = vector.extract_strided_slice %14 {offsets = [0, 0, 0], sizes = [2, 8, 8], strides = [1, 1, 1]} : vector<2x8x32xbf16> to vector<2x8x8xbf16>
    %25 = vector.extract_strided_slice %17 {offsets = [0, 0, 0], sizes = [2, 8, 8], strides = [1, 1, 1]} : vector<2x8x32xbf16> to vector<2x8x8xbf16>
    "tpu.trace_start"() <{level = 10 : i32, message = "bqd,bkd->bqk"}> : () -> ()
    %cst_13 = arith.constant dense<0.000000e+00> : vector<2x8x8xf32>
    %26 = tpu.matmul %23, %24, %cst_13 {dimension_numbers = #tpu.dot_dimension_numbers<[2], [2], [1], [1], [0, 0, 0, 1, 1, 1], [0], [0]>} : vector<2x8x8xbf16>, vector<2x8x8xbf16>, vector<2x8x8xf32> -> vector<2x8x8xf32>
    "tpu.trace_stop"() : () -> ()
    %27 = arith.addf %26, %20 : vector<2x8x8xf32>
    %cst_14 = arith.constant dense<0xFF800000> : vector<2x8xf32>
    %28 = vector.multi_reduction <maximumf>, %27, %cst_14 [2] : vector<2x8x8xf32> to vector<2x8xf32>
    %29 = vector.shape_cast %28 : vector<2x8xf32> to vector<2x8x1xf32>
    %30 = vector.broadcast %29 : vector<2x8x1xf32> to vector<2x8x8xf32>
    %31 = arith.subf %27, %30 : vector<2x8x8xf32>
    %32 = math.exp %31 : vector<2x8x8xf32>
    %cst_15 = arith.constant dense<0.000000e+00> : vector<2x8xf32>
    %33 = vector.multi_reduction <add>, %32, %cst_15 [2] : vector<2x8x8xf32> to vector<2x8xf32>
    %34 = vector.shape_cast %33 : vector<2x8xf32> to vector<2x8x1xf32>
    %35 = tpu.reciprocal %34 {approx = true} : vector<2x8x1xf32> -> vector<2x8x1xf32>
    %36 = vector.broadcast %35 : vector<2x8x1xf32> to vector<2x8x8xf32>
    %37 = arith.mulf %32, %36 : vector<2x8x8xf32>
    %38 = arith.truncf %37 : vector<2x8x8xf32> to vector<2x8x8xbf16>
    "tpu.trace_start"() <{level = 10 : i32, message = "bqk,bkd->bqd"}> : () -> ()
    %cst_16 = arith.constant dense<0.000000e+00> : vector<2x8x8xf32>
    %39 = tpu.matmul %38, %25, %cst_16 {dimension_numbers = #tpu.dot_dimension_numbers<[2], [1], [1], [2], [0, 0, 0, 1, 1, 2], [0], [0]>} : vector<2x8x8xbf16>, vector<2x8x8xbf16>, vector<2x8x8xf32> -> vector<2x8x8xf32>
    "tpu.trace_stop"() : () -> ()
    %40 = vector.shape_cast %39 : vector<2x8x8xf32> to vector<16x8xf32>
    %41 = arith.truncf %40 : vector<16x8xf32> to vector<16x8xbf16>
    %42 = vector.extract_strided_slice %21 {offsets = [0, 0], sizes = [8, 32], strides = [1, 1]} : vector<32x32xbf16> to vector<8x32xbf16>
    %cst_17 = arith.constant dense<0.000000e+00> : vector<16x32xf32>
    %43 = tpu.matmul %41, %42, %cst_17 {dimension_numbers = #tpu.dot_dimension_numbers<[1], [0], [0], [1], [0, 0, 1, 1], [], []>} : vector<16x8xbf16>, vector<8x32xbf16>, vector<16x32xf32> -> vector<16x32xf32>
    %44 = arith.addf %22, %43 : vector<16x32xf32>
    %45 = vector.extract_strided_slice %11 {offsets = [0, 0, 8], sizes = [2, 8, 8], strides = [1, 1, 1]} : vector<2x8x32xbf16> to vector<2x8x8xbf16>
    %46 = vector.extract_strided_slice %14 {offsets = [0, 0, 8], sizes = [2, 8, 8], strides = [1, 1, 1]} : vector<2x8x32xbf16> to vector<2x8x8xbf16>
    %47 = vector.extract_strided_slice %17 {offsets = [0, 0, 8], sizes = [2, 8, 8], strides = [1, 1, 1]} : vector<2x8x32xbf16> to vector<2x8x8xbf16>
    "tpu.trace_start"() <{level = 10 : i32, message = "bqd,bkd->bqk"}> : () -> ()
    %cst_18 = arith.constant dense<0.000000e+00> : vector<2x8x8xf32>
    %48 = tpu.matmul %45, %46, %cst_18 {dimension_numbers = #tpu.dot_dimension_numbers<[2], [2], [1], [1], [0, 0, 0, 1, 1, 1], [0], [0]>} : vector<2x8x8xbf16>, vector<2x8x8xbf16>, vector<2x8x8xf32> -> vector<2x8x8xf32>
    "tpu.trace_stop"() : () -> ()
    %49 = arith.addf %48, %20 : vector<2x8x8xf32>
    %cst_19 = arith.constant dense<0xFF800000> : vector<2x8xf32>
    %50 = vector.multi_reduction <maximumf>, %49, %cst_19 [2] : vector<2x8x8xf32> to vector<2x8xf32>
    %51 = vector.shape_cast %50 : vector<2x8xf32> to vector<2x8x1xf32>
    %52 = vector.broadcast %51 : vector<2x8x1xf32> to vector<2x8x8xf32>
    %53 = arith.subf %49, %52 : vector<2x8x8xf32>
    %54 = math.exp %53 : vector<2x8x8xf32>
    %cst_20 = arith.constant dense<0.000000e+00> : vector<2x8xf32>
    %55 = vector.multi_reduction <add>, %54, %cst_20 [2] : vector<2x8x8xf32> to vector<2x8xf32>
    %56 = vector.shape_cast %55 : vector<2x8xf32> to vector<2x8x1xf32>
    %57 = tpu.reciprocal %56 {approx = true} : vector<2x8x1xf32> -> vector<2x8x1xf32>
    %58 = vector.broadcast %57 : vector<2x8x1xf32> to vector<2x8x8xf32>
    %59 = arith.mulf %54, %58 : vector<2x8x8xf32>
    %60 = arith.truncf %59 : vector<2x8x8xf32> to vector<2x8x8xbf16>
    "tpu.trace_start"() <{level = 10 : i32, message = "bqk,bkd->bqd"}> : () -> ()
    %cst_21 = arith.constant dense<0.000000e+00> : vector<2x8x8xf32>
    %61 = tpu.matmul %60, %47, %cst_21 {dimension_numbers = #tpu.dot_dimension_numbers<[2], [1], [1], [2], [0, 0, 0, 1, 1, 2], [0], [0]>} : vector<2x8x8xbf16>, vector<2x8x8xbf16>, vector<2x8x8xf32> -> vector<2x8x8xf32>
    "tpu.trace_stop"() : () -> ()
    %62 = vector.shape_cast %61 : vector<2x8x8xf32> to vector<16x8xf32>
    %63 = arith.truncf %62 : vector<16x8xf32> to vector<16x8xbf16>
    %64 = vector.extract_strided_slice %21 {offsets = [8, 0], sizes = [8, 32], strides = [1, 1]} : vector<32x32xbf16> to vector<8x32xbf16>
    %cst_22 = arith.constant dense<0.000000e+00> : vector<16x32xf32>
    %65 = tpu.matmul %63, %64, %cst_22 {dimension_numbers = #tpu.dot_dimension_numbers<[1], [0], [0], [1], [0, 0, 1, 1], [], []>} : vector<16x8xbf16>, vector<8x32xbf16>, vector<16x32xf32> -> vector<16x32xf32>
    %66 = arith.addf %44, %65 : vector<16x32xf32>
    %67 = vector.extract_strided_slice %11 {offsets = [0, 0, 16], sizes = [2, 8, 8], strides = [1, 1, 1]} : vector<2x8x32xbf16> to vector<2x8x8xbf16>
    %68 = vector.extract_strided_slice %14 {offsets = [0, 0, 16], sizes = [2, 8, 8], strides = [1, 1, 1]} : vector<2x8x32xbf16> to vector<2x8x8xbf16>
    %69 = vector.extract_strided_slice %17 {offsets = [0, 0, 16], sizes = [2, 8, 8], strides = [1, 1, 1]} : vector<2x8x32xbf16> to vector<2x8x8xbf16>
    "tpu.trace_start"() <{level = 10 : i32, message = "bqd,bkd->bqk"}> : () -> ()
    %cst_23 = arith.constant dense<0.000000e+00> : vector<2x8x8xf32>
    %70 = tpu.matmul %67, %68, %cst_23 {dimension_numbers = #tpu.dot_dimension_numbers<[2], [2], [1], [1], [0, 0, 0, 1, 1, 1], [0], [0]>} : vector<2x8x8xbf16>, vector<2x8x8xbf16>, vector<2x8x8xf32> -> vector<2x8x8xf32>
    "tpu.trace_stop"() : () -> ()
    %71 = arith.addf %70, %20 : vector<2x8x8xf32>
    %cst_24 = arith.constant dense<0xFF800000> : vector<2x8xf32>
    %72 = vector.multi_reduction <maximumf>, %71, %cst_24 [2] : vector<2x8x8xf32> to vector<2x8xf32>
    %73 = vector.shape_cast %72 : vector<2x8xf32> to vector<2x8x1xf32>
    %74 = vector.broadcast %73 : vector<2x8x1xf32> to vector<2x8x8xf32>
    %75 = arith.subf %71, %74 : vector<2x8x8xf32>
    %76 = math.exp %75 : vector<2x8x8xf32>
    %cst_25 = arith.constant dense<0.000000e+00> : vector<2x8xf32>
    %77 = vector.multi_reduction <add>, %76, %cst_25 [2] : vector<2x8x8xf32> to vector<2x8xf32>
    %78 = vector.shape_cast %77 : vector<2x8xf32> to vector<2x8x1xf32>
    %79 = tpu.reciprocal %78 {approx = true} : vector<2x8x1xf32> -> vector<2x8x1xf32>
    %80 = vector.broadcast %79 : vector<2x8x1xf32> to vector<2x8x8xf32>
    %81 = arith.mulf %76, %80 : vector<2x8x8xf32>
    %82 = arith.truncf %81 : vector<2x8x8xf32> to vector<2x8x8xbf16>
    "tpu.trace_start"() <{level = 10 : i32, message = "bqk,bkd->bqd"}> : () -> ()
    %cst_26 = arith.constant dense<0.000000e+00> : vector<2x8x8xf32>
    %83 = tpu.matmul %82, %69, %cst_26 {dimension_numbers = #tpu.dot_dimension_numbers<[2], [1], [1], [2], [0, 0, 0, 1, 1, 2], [0], [0]>} : vector<2x8x8xbf16>, vector<2x8x8xbf16>, vector<2x8x8xf32> -> vector<2x8x8xf32>
    "tpu.trace_stop"() : () -> ()
    %84 = vector.shape_cast %83 : vector<2x8x8xf32> to vector<16x8xf32>
    %85 = arith.truncf %84 : vector<16x8xf32> to vector<16x8xbf16>
    %86 = vector.extract_strided_slice %21 {offsets = [16, 0], sizes = [8, 32], strides = [1, 1]} : vector<32x32xbf16> to vector<8x32xbf16>
    %cst_27 = arith.constant dense<0.000000e+00> : vector<16x32xf32>
    %87 = tpu.matmul %85, %86, %cst_27 {dimension_numbers = #tpu.dot_dimension_numbers<[1], [0], [0], [1], [0, 0, 1, 1], [], []>} : vector<16x8xbf16>, vector<8x32xbf16>, vector<16x32xf32> -> vector<16x32xf32>
    %88 = arith.addf %66, %87 : vector<16x32xf32>
    %89 = vector.extract_strided_slice %11 {offsets = [0, 0, 24], sizes = [2, 8, 8], strides = [1, 1, 1]} : vector<2x8x32xbf16> to vector<2x8x8xbf16>
    %90 = vector.extract_strided_slice %14 {offsets = [0, 0, 24], sizes = [2, 8, 8], strides = [1, 1, 1]} : vector<2x8x32xbf16> to vector<2x8x8xbf16>
    %91 = vector.extract_strided_slice %17 {offsets = [0, 0, 24], sizes = [2, 8, 8], strides = [1, 1, 1]} : vector<2x8x32xbf16> to vector<2x8x8xbf16>
    "tpu.trace_start"() <{level = 10 : i32, message = "bqd,bkd->bqk"}> : () -> ()
    %cst_28 = arith.constant dense<0.000000e+00> : vector<2x8x8xf32>
    %92 = tpu.matmul %89, %90, %cst_28 {dimension_numbers = #tpu.dot_dimension_numbers<[2], [2], [1], [1], [0, 0, 0, 1, 1, 1], [0], [0]>} : vector<2x8x8xbf16>, vector<2x8x8xbf16>, vector<2x8x8xf32> -> vector<2x8x8xf32>
    "tpu.trace_stop"() : () -> ()
    %93 = arith.addf %92, %20 : vector<2x8x8xf32>
    %cst_29 = arith.constant dense<0xFF800000> : vector<2x8xf32>
    %94 = vector.multi_reduction <maximumf>, %93, %cst_29 [2] : vector<2x8x8xf32> to vector<2x8xf32>
    %95 = vector.shape_cast %94 : vector<2x8xf32> to vector<2x8x1xf32>
    %96 = vector.broadcast %95 : vector<2x8x1xf32> to vector<2x8x8xf32>
    %97 = arith.subf %93, %96 : vector<2x8x8xf32>
    %98 = math.exp %97 : vector<2x8x8xf32>
    %cst_30 = arith.constant dense<0.000000e+00> : vector<2x8xf32>
    %99 = vector.multi_reduction <add>, %98, %cst_30 [2] : vector<2x8x8xf32> to vector<2x8xf32>
    %100 = vector.shape_cast %99 : vector<2x8xf32> to vector<2x8x1xf32>
    %101 = tpu.reciprocal %100 {approx = true} : vector<2x8x1xf32> -> vector<2x8x1xf32>
    %102 = vector.broadcast %101 : vector<2x8x1xf32> to vector<2x8x8xf32>
    %103 = arith.mulf %98, %102 : vector<2x8x8xf32>
    %104 = arith.truncf %103 : vector<2x8x8xf32> to vector<2x8x8xbf16>
    "tpu.trace_start"() <{level = 10 : i32, message = "bqk,bkd->bqd"}> : () -> ()
    %cst_31 = arith.constant dense<0.000000e+00> : vector<2x8x8xf32>
    %105 = tpu.matmul %104, %91, %cst_31 {dimension_numbers = #tpu.dot_dimension_numbers<[2], [1], [1], [2], [0, 0, 0, 1, 1, 2], [0], [0]>} : vector<2x8x8xbf16>, vector<2x8x8xbf16>, vector<2x8x8xf32> -> vector<2x8x8xf32>
    "tpu.trace_stop"() : () -> ()
    %106 = vector.shape_cast %105 : vector<2x8x8xf32> to vector<16x8xf32>
    %107 = arith.truncf %106 : vector<16x8xf32> to vector<16x8xbf16>
    %108 = vector.extract_strided_slice %21 {offsets = [24, 0], sizes = [8, 32], strides = [1, 1]} : vector<32x32xbf16> to vector<8x32xbf16>
    %cst_32 = arith.constant dense<0.000000e+00> : vector<16x32xf32>
    %109 = tpu.matmul %107, %108, %cst_32 {dimension_numbers = #tpu.dot_dimension_numbers<[1], [0], [0], [1], [0, 0, 1, 1], [], []>} : vector<16x8xbf16>, vector<8x32xbf16>, vector<16x32xf32> -> vector<16x32xf32>
    %110 = arith.addf %88, %109 : vector<16x32xf32>
    %c0_33 = arith.constant 0 : index
    %c0_34 = arith.constant 0 : index
    %111 = vector.load %arg6[%c0_33, %c0_34] : memref<1x32xf32, #tpu.memory_space<vmem>>, vector<1x32xf32>
    %112 = vector.broadcast %111 : vector<1x32xf32> to vector<16x32xf32>
    %113 = arith.addf %110, %112 : vector<16x32xf32>
    %114 = vector.shape_cast %113 : vector<16x32xf32> to vector<2x8x32xf32>
    %c0_35 = arith.constant 0 : index
    %c0_36 = arith.constant 0 : index
    %c0_37 = arith.constant 0 : index
    %115 = vector.load %arg7[%c0_35, %c0_36, %c0_37] : memref<2x8x32xf32, #tpu.memory_space<vmem>>, vector<2x8x32xf32>
    tpu.vector_store %arg7[%c0_35, %c0_36, %c0_37], %114 {strides = array<i32>} : memref<2x8x32xf32, #tpu.memory_space<vmem>>, vector<2x8x32xf32>,
    return
  }
  func.func @transform_0(%arg0: i32) -> (i32, i32, i32) {
    %c0_i32 = arith.constant 0 : i32
    %c0_i32_0 = arith.constant 0 : i32
    %c0_i32_1 = arith.constant 0 : i32
    return %arg0, %c0_i32, %c0_i32_0 : i32, i32, i32
  }
  func.func @transform_1(%arg0: i32) -> (i32, i32, i32) {
    %c0_i32 = arith.constant 0 : i32
    %c0_i32_0 = arith.constant 0 : i32
    %c0_i32_1 = arith.constant 0 : i32
    return %arg0, %c0_i32, %c0_i32_0 : i32, i32, i32
  }
  func.func @transform_2(%arg0: i32) -> (i32, i32) {
    %c0_i32 = arith.constant 0 : i32
    %c0_i32_0 = arith.constant 0 : i32
    %c0_i32_1 = arith.constant 0 : i32
    return %c0_i32, %c0_i32_0 : i32, i32
  }
  func.func @transform_3(%arg0: i32) -> (i32, i32) {
    %c0_i32 = arith.constant 0 : i32
    %c0_i32_0 = arith.constant 0 : i32
    %c0_i32_1 = arith.constant 0 : i32
    return %c0_i32, %c0_i32_0 : i32, i32
  }
  func.func @transform_4(%arg0: i32) -> (i32, i32) {
    %c0_i32 = arith.constant 0 : i32
    %c0_i32_0 = arith.constant 0 : i32
    %c0_i32_1 = arith.constant 0 : i32
    return %c0_i32, %c0_i32_0 : i32, i32
  }
  func.func @transform_5(%arg0: i32) -> (i32, i32) {
    %c0_i32 = arith.constant 0 : i32
    %c0_i32_0 = arith.constant 0 : i32
    %c0_i32_1 = arith.constant 0 : i32
    return %c0_i32, %c0_i32_0 : i32, i32
  }
  func.func @transform_6(%arg0: i32) -> (i32, i32, i32) {
    %c0_i32 = arith.constant 0 : i32
    %c0_i32_0 = arith.constant 0 : i32
    %c0_i32_1 = arith.constant 0 : i32
    return %arg0, %c0_i32, %c0_i32_0 : i32, i32, i32
  }
}

</mosaic_0001>

<bundles_post_ra>
// kernel: tpu_custom_call.1
= control target key start
LH: loop header
LB: loop body
LE: loop exit
PB: predicated region body
PF: predicated region fallthrough
CT: control target
= control target key end

     0   :  { %11 = vsyncpa [#allocation3], 0  ;;  %s1939_s0 = inlined_call_operand.hbm [shape: bf16[2,8,32], index: 0, kind: input, shape index: {}]   ;;  %s1940_s1 = inlined_call_operand.vmem [shape: f32[2,1,8], index: 1, kind: input, shape index: {}]   ;;  %s1941_s2 = inlined_call_operand.hbm [shape: bf16[32,96], index: 2, kind: input, shape index: {}]   ;;  %s1942_s3 = inlined_call_operand.vmem [shape: f32[1,96], index: 3, kind: input, shape index: {}]   ;;  %s1943_s4 = inlined_call_operand.hbm [shape: bf16[32,32], index: 4, kind: input, shape index: {}]   ;;  %s1944_s5 = inlined_call_operand.vmem [shape: f32[1,32], index: 5, kind: input, shape index: {}]   ;;  %s1945_s6 = inlined_call_operand.hbm [shape: f32[2,8,32], index: 6, kind: output, shape index: {}]  }
   0x1   :  { %12 = vsyncpa [#allocation6], 0 }
   0x2   :  { %13 = vsyncpa [#allocation4], 0  ;;  %s1620_s21 = smov [#allocation5]   ;;  %s1621_s23 = smov [#allocation2]  }
   0x3   :  { %s33_s22 = sshll.u32 %s1620_s21, 4  ;;  %s19_s24 = sshll.u32 %s1621_s23, 4  ;;  %s34_s22 = int_to_ptr.vmem [resolvable:$true] %s33_s22  ;;  %s1675_s24 = int_to_ptr.vmem [resolvable:$true] %s19_s24 }
   0x4   :  { %s1526_s27 = scalar_lea.hbm %s1941_s2, 256 }
   0x5   :  { %p1527_p0 = scmp.ne.s32.totalorder %s1941_s2, %s1526_s27  ;;  %p1530_p1 = scmp.lt.u32.totalorder %s1526_s27, %s1941_s2 }
   0x7   :  { %p1532_p2 = pnand %p1530_p1, %p1527_p0 }
   0x9   :  { %1535 = shalt.err (!%p1532_p2)
}
   0xa   :  { %s1536_s8 = scalar_lea.vmem %s34_s22, 256  ;;  %p1541_p4 = scmp.lt.s32.totalorder %s34_s22, %s34_s22 }
   0xb   :  { %p1537_p3 = scmp.ne.s32.totalorder %s34_s22, %s1536_s8  ;;  %p1542_p5 = scmp.lt.s32.totalorder %s1536_s8, %s1536_s8 }
   0xd   :  { %p1543_p6 = por %p1542_p5, %p1541_p4 }
   0xf   :  { %p1544_p7 = pnand %p1543_p6, %p1537_p3 }
  0x11   :  { %1547 = shalt.err (!%p1544_p7)
}
  0x12   :  { %s1622_s9 = smov 64   ;;  %s1623_s10 = smov 4  }
  0x13   :  { %39 = dma.hbm_to_vmem [thread:$0]  %s1941_s2, 256, %s34_s22, [#allocation6], %s1622_s9, %s1622_s9, %s1623_s10  }
  0x14   :  { %s1548_s15 = scalar_lea.hbm %s1939_s0, 128 }
  0x15   :  { %p1549_p8 = scmp.ne.s32.totalorder %s1939_s0, %s1548_s15  ;;  %p1552_p9 = scmp.lt.u32.totalorder %s1548_s15, %s1939_s0 }
  0x17   :  { %p1554_p10 = pnand %p1552_p9, %p1549_p8 }
  0x19   :  { %1557 = shalt.err (!%p1554_p10)
}
  0x1a   :  { %s1558_s20 = scalar_lea.vmem %s1675_s24, 128  ;;  %p1563_p12 = scmp.lt.s32.totalorder %s1675_s24, %s1675_s24 }
  0x1b   :  { %p1559_p11 = scmp.ne.s32.totalorder %s1675_s24, %s1558_s20  ;;  %p1564_p13 = scmp.lt.s32.totalorder %s1558_s20, %s1558_s20 }
  0x1d   :  { %p1565_p0 = por %p1564_p13, %p1563_p12 }
  0x1f   :  { %p1566_p1 = pnand %p1565_p0, %p1559_p11 }
  0x21   :  { %1569 = shalt.err (!%p1566_p1)
}
  0x22   :  { %25 = dma.hbm_to_vmem [thread:$0]  %s1939_s0, 128, %s1675_s24, [#allocation3], %s1622_s9, %s1622_s9, %s1623_s10  }
  0x23   :  { %s1624_s22 = smov [#allocation7]   ;;  %s1570_s27 = scalar_lea.hbm %s1943_s4, 256 }
  0x24   :  { %s47_s23 = sshll.u32 %s1624_s22, 4  ;;  %p1571_p2 = scmp.ne.s32.totalorder %s1943_s4, %s1570_s27  ;;  %s48_s23 = int_to_ptr.vmem [resolvable:$true] %s47_s23 }
  0x25   :  { %p1574_p3 = scmp.lt.u32.totalorder %s1570_s27, %s1943_s4 }
  0x27   :  { %p1576_p4 = pnand %p1574_p3, %p1571_p2 }
  0x29   :  { %1579 = shalt.err (!%p1576_p4)
}
  0x2a   :  { %s1580_s8 = scalar_lea.vmem %s48_s23, 256  ;;  %p1585_p6 = scmp.lt.s32.totalorder %s48_s23, %s48_s23 }
  0x2b   :  { %p1581_p5 = scmp.ne.s32.totalorder %s48_s23, %s1580_s8  ;;  %p1586_p7 = scmp.lt.s32.totalorder %s1580_s8, %s1580_s8 }
  0x2d   :  { %p1587_p8 = por %p1586_p7, %p1585_p6 }
  0x2f   :  { %p1588_p9 = pnand %p1587_p8, %p1581_p5 }
  0x31   :  { %1591 = shalt.err (!%p1588_p9)
}
  0x32   :  { %53 = dma.hbm_to_vmem [thread:$0]  %s1943_s4, 256, %s48_s23, [#allocation6], %s1622_s9, %s1622_s9, %s1623_s10  }
  0x33   :  { %1614 = dma.done.wait [#allocation3], 128  }
  0x34   :  { %1615 = vsyncadd [#allocation3], 4294967168 }
  0x35   :  { %1616 = dma.done.wait [#allocation6], 512  }
  0x36   :  { %1617 = vsyncadd [#allocation6], 4294966784  ;;  %v1625_v0 = vmov 0.0   ;;  %vm1626_vm0 = vmmov 0   ;;  %v1491_v1 = vld [vmem:[#allocation5] sm:$0xff]   ;;  %v1492_v2 = vld [vmem:[#allocation5 + $0x8] sm:$0xff]  }
  0x37   :  { %1343 = vmatprep.subr.bf16.mxu0 %v1625_v0  ;;  %1347 = vmatprep.mubr.msk.bf16.mxu0 %vm1626_vm0, %v1625_v0  ;;  %v1493_v3 = vld [vmem:[#allocation2] sm:$0xff]   ;;  %vm96_vm1 = vcmask 261120   ;;  %s1627_s11 = smov 96   ;;  %vm168_vm2 = vcmask 64512   ;;  %vm293_vm3 = vcmask 1043456   ;;  %s1630_s15 = smov 56  }
  0x38   :  { %1351 = vmatprep.subr.bf16.mxu1 %v1625_v0  ;;  %1353 = vmatprep.mubr.msk.bf16.mxu1 %vm1626_vm0, %v1625_v0  ;;  %v1272_v4 = vld [vmem:[%s1942_s3] ss:$0 sm:$0xff]  ;;  %v1772_v26 = vld [vmem:[%s1940_s1 + $0x1] ss:$0 sm:$0xff]  ;;  %s1631_s16 = smov 112   ;;  %s1632_s17 = smov 80  }
  0x39   :  { %1344 = vmatpush3.bf16.msra.mxu0 %v1491_v1  ;;  %v1766_v21 = vld [vmem:[%s1940_s1] ss:$0 sm:$0xff]  ;;  %s1628_s1 = smov 88   ;;  %s1633_s18 = smov 48  }
  0x3a   :  { %1345 = vmatprep.subr.bf16.mxu0 %v1625_v0  ;;  %s1634_s19 = smov 72   ;;  %s1635_s20 = smov 104  }
  0x3b   :  { %s1636_s2 = smov 40   ;;  %s1637_s23 = smov [#allocation8]  }
  0x3c   :  { %s1259_s25 = sshll.u32 %s1637_s23, 4  ;;  %s1260_s25 = int_to_ptr.vmem [resolvable:$true] %s1259_s25 }
  0x3d   :  { %1346 = vmatpush3.bf16.msra.mxu0 %v1492_v2  ;;  %s1592_s26 = scalar_lea.vmem %s1260_s25, 256  ;;  %p1597_p11 = scmp.lt.s32.totalorder %s1260_s25, %s1260_s25 }
  0x3e   :  { %1357 = vmatprep.subr.bf16.mxu0 %v1625_v0  ;;  %p1593_p10 = scmp.ne.s32.totalorder %s1260_s25, %s1592_s26  ;;  %p1598_p12 = scmp.lt.s32.totalorder %s1592_s26, %s1592_s26 }
  0x40   :  { %1348 = vmatmul.mubr.msk.bf16.vlgmr.msra.gmra.mrb[0].mxu0 %vm96_vm1, %v1493_v3  ;;  %p1599_p13 = por %p1598_p12, %p1597_p11 }
  0x41   :  { %1359 = vmatprep.mubr.msk.bf16.mxu0 %vm1626_vm0, %v1625_v0 }
  0x42   :  { %p1600_p0 = pnand %p1599_p13, %p1593_p10 }
 0x113   :  { %v134_v5 = vpop.f32.mrb[0].mxu0 }
 0x114   :  { %v135_v6 = vadd.f32 %v1272_v4, %v134_v5  ;;  %v1349_v7 = vpop.f32.mrb[1].mxu0 }
 0x115   :  { %v137_v8 = vpop.f32.mrb[2].mxu0 }
 0x116   :  { %v1741_v9 = vpack.c.bf16 %v135_v6, %v135_v6  ;;  %v138_v10 = vadd.f32 %v1272_v4, %v137_v8  ;;  %v1350_v11 = vpop.f32.mrb[3].mxu0  ;;  %v141_v15 = vmul.f32 0.35355338, %v135_v6 }
 0x118   :  { %166 = vrot.lane.b32.xlu0 %v1741_v9, %s1627_s11  ;;  %v1744_v12 = vpack.c.bf16 %v138_v10, %v138_v10  ;;  %v1750_v18 = vpack.c.bf16 %v141_v15, %v141_v15  ;;  %v142_v19 = vmul.f32 0.35355338, %v138_v10 }
 0x11a   :  { %v1757_v20 = vpack.c.bf16 %v142_v19, %v142_v19 }
 0x11c   :  { %216 = vrot.lane.b32.xlu0 %v1744_v12, %s1627_s11 }
 0x18a   :  { %v167_v13 = vpop.permute.xlu0 %166 }
 0x18b   :  { %v173_v14 = vsel %vm168_vm2, %v167_v13, 0 }
 0x18c   :  { %1352 = vmatpush3.bf16.xpose.msra.mxu1 %v173_v14 }
 0x18d   :  { %1363 = vmatprep.subr.bf16.mxu1 %v1625_v0 }
 0x18e   :  { %v217_v16 = vpop.permute.xlu0 %216 }
 0x18f   :  { %v222_v17 = vsel %vm168_vm2, %v217_v16, 0 }
 0x190   :  { %1358 = vmatpush3.bf16.xpose.msra.mxu0 %v222_v17 }
 0x191   :  { %1369 = vmatprep.subr.bf16.mxu0 %v1625_v0 }
 0x193   :  { %1354 = vmatmul.mubr.msk.bf16.vlgmr.msra.gmra.mrb[0].mxu1 %vm168_vm2, %v1750_v18 }
 0x194   :  { %1365 = vmatprep.mubr.msk.bf16.mxu1 %vm1626_vm0, %v1625_v0 }
 0x197   :  { %1360 = vmatmul.mubr.msk.bf16.vlgmr.msra.gmra.mrb[4].mxu0 %vm168_vm2, %v1757_v20 }
 0x198   :  { %1371 = vmatprep.mubr.msk.bf16.mxu0 %vm1626_vm0, %v1625_v0 }
 0x266   :  { %v209_v22 = vpop.f32.mrb[0].mxu1 }
 0x267   :  { %v210_v23 = vadd.f32 %v1766_v21, %v209_v22  ;;  %v1355_v24 = vpop.f32.mrb[1].mxu1 }
 0x268   :  { %v212_v25 = vpop.f32.mrb[2].mxu1 }
 0x269   :  { %v1356_v27 = vpop.f32.mrb[3].mxu1  ;;  %v264_v28 = vsel %vm168_vm2, %v210_v23, -inf }
 0x26a   :  { %265 = vmax.xlane.f32.xlu1 %v264_v28  ;;  %v258_v29 = vpop.f32.mrb[4].mxu0 }
 0x26b   :  { %v259_v30 = vadd.f32 %v1772_v26, %v258_v29  ;;  %v1361_v31 = vpop.f32.mrb[5].mxu0 }
 0x26c   :  { %v261_v32 = vpop.f32.mrb[6].mxu0 }
 0x26d   :  { %v1362_v33 = vpop.f32.mrb[7].mxu0  ;;  %v267_v34 = vsel %vm168_vm2, %v259_v30, -inf }
 0x26e   :  { %268 = vmax.xlane.f32.xlu1 %v267_v34 }
 0x27f   :  { %288 = vrot.lane.b32.xlu1 %v1741_v9, %s1622_s9 }
 0x283   :  { %337 = vrot.lane.b32.xlu1 %v1744_v12, %s1622_s9  ;;  %s1629_s9 = smov 120  }
 0x287   :  { %389 = vrot.lane.b32.xlu1 %v1741_v9, %s1628_s1 }
 0x2f7   :  { %v266_v35 = vpop.xlane.xlu1 %265 }
 0x2f8   :  { %v270_v36 = vsub.f32 %v210_v23, %v266_v35 }
 0x2fa   :  { %v272_v37 = vmul.f32 1.442695, %v270_v36 }
 0x2fb   :  { %v269_v38 = vpop.xlane.xlu1 %268 }
 0x2fc   :  { %1494 = vpow2.f32 %v272_v37  ;;  %v271_v39 = vsub.f32 %v259_v30, %v269_v38 }
 0x2fe   :  { %v274_v40 = vmul.f32 1.442695, %v271_v39 }
 0x2ff   :  { %v289_v41 = vpop.permute.xlu1 %288 }
 0x300   :  { %1496 = vpow2.f32 %v274_v40  ;;  %v295_v42 = vsel %vm293_vm3, %v289_v41, 0 }
 0x301   :  { %1364 = vmatpush3.bf16.msra.mxu1 %v295_v42 }
 0x302   :  { %1375 = vmatprep.subr.bf16.mxu1 %v1625_v0 }
 0x303   :  { %v338_v43 = vpop.permute.xlu1 %337 }
 0x304   :  { %v343_v44 = vsel %vm293_vm3, %v338_v43, 0 }
 0x305   :  { %1370 = vmatpush3.bf16.msra.mxu0 %v343_v44  ;;  %v162_v44 = vld [vmem:[#allocation7 + $0x4] sm:$0xf] }
 0x306   :  { %v1495_v45 = vpop.eup %1494  ;;  %1381 = vmatprep.subr.bf16.mxu0 %v1625_v0 }
 0x307   :  { %v276_v46 = vsel %vm168_vm2, %v1495_v45, 0.0  ;;  %v390_v49 = vpop.permute.xlu1 %389 }
 0x308   :  { %277 = vadd.xlane.f32.xlu0 %v276_v46  ;;  %v395_v56 = vsel %vm168_vm2, %v390_v49, 0  ;;  %v161_v49 = vld [vmem:[#allocation7] sm:$0xf] }
 0x30a   :  { %v1497_v47 = vpop.eup %1496 }
 0x30b   :  { %v279_v48 = vsel %vm168_vm2, %v1497_v47, 0.0 }
 0x30c   :  { %280 = vadd.xlane.f32.xlu1 %v279_v48 }
 0x31d   :  { %440 = vrot.lane.b32.xlu1 %v1744_v12, %s1628_s1 }
 0x31e   :  { %387 = vrot.lane.b32.xlu0 %v1750_v18, %s1629_s9 }
 0x321   :  { %438 = vrot.lane.b32.xlu1 %v1757_v20, %s1629_s9 }
 0x395   :  { %v278_v50 = vpop.xlane.xlu0 %277 }
 0x396   :  { %1498 = vrcp.f32 %v278_v50 }
 0x399   :  { %v281_v51 = vpop.xlane.xlu1 %280  ;;  %v388_v61 = vpop.permute.xlu0 %387 }
 0x39a   :  { %1500 = vrcp.f32 %v281_v51 }
 0x39d   :  { %v441_v58 = vpop.permute.xlu1 %440 }
 0x39e   :  { %v446_v60 = vsel %vm168_vm2, %v441_v58, 0 }
 0x3a0   :  { %v1499_v52 = vpop.eup %1498 }
 0x3a1   :  { %v284_v53 = vmul.f32 %v1499_v52, %v1495_v45  ;;  %v439_v62 = vpop.permute.xlu1 %438  ;;  %v660_v52 = vsel %vm293_vm3, %v161_v49, 0 }
 0x3a3   :  { %v286_v54 = vpack.c.bf16 %v284_v53, %v284_v53 }
 0x3a4   :  { %v1501_v55 = vpop.eup %1500 }
 0x3a5   :  { %v285_v57 = vmul.f32 %v1501_v55, %v1497_v47  ;;  %1366 = vmatmul.mubr.msk.bf16.vlgmr.msra.gmra.mrb[4].mxu1 %vm168_vm2, %v286_v54  ;;  %v613_v47 = vsel %vm293_vm3, %v162_v44, 0 }
 0x3a6   :  { %1376 = vmatpush3.bf16.xpose.msra.mxu1 %v395_v56  ;;  %1377 = vmatprep.mubr.msk.bf16.mxu1 %vm1626_vm0, %v1625_v0 }
 0x3a7   :  { %v287_v59 = vpack.c.bf16 %v285_v57, %v285_v57  ;;  %1387 = vmatprep.subr.bf16.mxu1 %v1625_v0 }
 0x3a9   :  { %1372 = vmatmul.mubr.msk.bf16.vlgmr.msra.gmra.mrb[8].mxu0 %vm168_vm2, %v287_v59 }
 0x3aa   :  { %1382 = vmatpush3.bf16.xpose.msra.mxu0 %v446_v60  ;;  %1383 = vmatprep.mubr.msk.bf16.mxu0 %vm1626_vm0, %v1625_v0 }
 0x3ab   :  { %1393 = vmatprep.subr.bf16.mxu0 %v1625_v0 }
 0x3ad   :  { %1378 = vmatmul.mubr.msk.bf16.vlgmr.msra.gmra.mrb[8].mxu1 %vm168_vm2, %v388_v61 }
 0x3ae   :  { %1389 = vmatprep.mubr.msk.bf16.mxu1 %vm1626_vm0, %v1625_v0 }
 0x3b1   :  { %1384 = vmatmul.mubr.msk.bf16.vlgmr.msra.gmra.mrb[12].mxu0 %vm168_vm2, %v439_v62 }
 0x3b2   :  { %1395 = vmatprep.mubr.msk.bf16.mxu0 %vm1626_vm0, %v1625_v0 }
 0x478   :  { %v1807_v63 = vpop.f32.mrb[4].mxu1 }
 0x479   :  { %v1367_v1 = vpop.f32.mrb[5].mxu1 }
 0x47a   :  { %v334_v2 = vpop.f32.mrb[6].mxu1 }
 0x47b   :  { %v1368_v3 = vpop.f32.mrb[7].mxu1 }
 0x47c   :  { %v1809_v4 = vpop.f32.mrb[8].mxu0 }
 0x47d   :  { %v385_v5 = vpack.c.bf16 %v1809_v4, %v1807_v63  ;;  %v1373_v6 = vpop.f32.mrb[9].mxu0 }
 0x47e   :  { %v382_v7 = vpop.f32.mrb[10].mxu0 }
 0x47f   :  { %v1374_v8 = vpop.f32.mrb[11].mxu0 }
 0x480   :  { %v431_v10 = vpop.f32.mrb[8].mxu1 }
 0x481   :  { %v432_v11 = vadd.f32 %v1766_v21, %v431_v10  ;;  %v1379_v13 = vpop.f32.mrb[9].mxu1 }
 0x482   :  { %v434_v14 = vpop.f32.mrb[10].mxu1 }
 0x483   :  { %v1380_v15 = vpop.f32.mrb[11].mxu1  ;;  %v488_v16 = vsel %vm168_vm2, %v432_v11, -inf }
 0x484   :  { %489 = vmax.xlane.f32.xlu1 %v488_v16  ;;  %v482_v17 = vpop.f32.mrb[12].mxu0 }
 0x485   :  { %v483_v19 = vadd.f32 %v1772_v26, %v482_v17  ;;  %v1385_v22 = vpop.f32.mrb[13].mxu0 }
 0x486   :  { %v485_v23 = vpop.f32.mrb[14].mxu0 }
 0x487   :  { %v1386_v24 = vpop.f32.mrb[15].mxu0  ;;  %v491_v25 = vsel %vm168_vm2, %v483_v19, -inf }
 0x488   :  { %492 = vmax.xlane.f32.xlu0 %v491_v25 }
 0x49e   :  { %560 = vrot.lane.b32.xlu0 %v1744_v12, %s1630_s15 }
 0x4a2   :  { %703 = vrot.lane.b32.xlu0 %v1750_v18, %s1631_s16 }
 0x511   :  { %v490_v27 = vpop.xlane.xlu1 %489 }
 0x512   :  { %v494_v28 = vsub.f32 %v432_v11, %v490_v27 }
 0x514   :  { %v496_v29 = vmul.f32 1.442695, %v494_v28 }
 0x515   :  { %v493_v30 = vpop.xlane.xlu0 %492 }
 0x516   :  { %1502 = vpow2.f32 %v496_v29  ;;  %v495_v31 = vsub.f32 %v483_v19, %v493_v30 }
 0x518   :  { %v498_v32 = vmul.f32 1.442695, %v495_v31 }
 0x519   :  { %v561_v33 = vpop.permute.xlu0 %560 }
 0x51a   :  { %1504 = vpow2.f32 %v498_v32  ;;  %v566_v34 = vsel %vm293_vm3, %v561_v33, 0 }
 0x51b   :  { %1394 = vmatpush3.bf16.msra.mxu0 %v566_v34 }
 0x51c   :  { %1405 = vmatprep.subr.bf16.mxu0 %v1625_v0 }
 0x51d   :  { %v704_v6 = vpop.permute.xlu0 %703 }
 0x520   :  { %v1503_v35 = vpop.eup %1502 }
 0x521   :  { %v500_v36 = vsel %vm168_vm2, %v1503_v35, 0.0 }
 0x522   :  { %501 = vadd.xlane.f32.xlu1 %v500_v36 }
 0x524   :  { %v1505_v37 = vpop.eup %1504 }
 0x525   :  { %v503_v38 = vsel %vm168_vm2, %v1505_v37, 0.0 }
 0x526   :  { %504 = vadd.xlane.f32.xlu1 %v503_v38 }
 0x537   :  { %512 = vrot.lane.b32.xlu1 %v1741_v9, %s1630_s15 }
 0x53b   :  { %705 = vrot.lane.b32.xlu1 %v1741_v9, %s1632_s17 }
 0x53f   :  { %755 = vrot.lane.b32.xlu1 %v1744_v12, %s1632_s17 }
 0x543   :  { %753 = vrot.lane.b32.xlu1 %v1757_v20, %s1631_s16 }
 0x5af   :  { %v502_v39 = vpop.xlane.xlu1 %501 }
 0x5b0   :  { %1506 = vrcp.f32 %v502_v39 }
 0x5b3   :  { %v505_v40 = vpop.xlane.xlu1 %504 }
 0x5b4   :  { %1508 = vrcp.f32 %v505_v40 }
 0x5b7   :  { %v513_v41 = vpop.permute.xlu1 %512 }
 0x5b8   :  { %v518_v42 = vsel %vm293_vm3, %v513_v41, 0 }
 0x5b9   :  { %1388 = vmatpush3.bf16.msra.mxu1 %v518_v42 }
 0x5ba   :  { %v1507_v43 = vpop.eup %1506  ;;  %1399 = vmatprep.subr.bf16.mxu1 %v1625_v0 }
 0x5bb   :  { %v508_v45 = vmul.f32 %v1507_v43, %v1503_v35  ;;  %v706_v53 = vpop.permute.xlu1 %705 }
 0x5bc   :  { %v711_v2 = vsel %vm168_vm2, %v706_v53, 0 }
 0x5bd   :  { %v510_v46 = vpack.c.bf16 %v508_v45, %v508_v45 }
 0x5be   :  { %v1509_v48 = vpop.eup %1508 }
 0x5bf   :  { %v509_v50 = vmul.f32 %v1509_v48, %v1505_v37  ;;  %1390 = vmatmul.mubr.msk.bf16.vlgmr.msra.gmra.mrb[12].mxu1 %vm168_vm2, %v510_v46  ;;  %v756_v54 = vpop.permute.xlu1 %755 }
 0x5c0   :  { %1400 = vmatpush3.bf16.msra.mxu1 %v613_v47  ;;  %1401 = vmatprep.mubr.msk.bf16.mxu1 %vm1626_vm0, %v1625_v0  ;;  %v761_v55 = vsel %vm168_vm2, %v756_v54, 0 }
 0x5c1   :  { %v511_v51 = vpack.c.bf16 %v509_v50, %v509_v50  ;;  %1411 = vmatprep.subr.bf16.mxu1 %v1625_v0 }
 0x5c3   :  { %1396 = vmatmul.mubr.msk.bf16.vlgmr.msra.gmra.mrb[16].mxu0 %vm168_vm2, %v511_v51  ;;  %v754_v56 = vpop.permute.xlu1 %753 }
 0x5c4   :  { %1406 = vmatpush3.bf16.msra.mxu0 %v660_v52  ;;  %1407 = vmatprep.mubr.msk.bf16.mxu0 %vm1626_vm0, %v1625_v0 }
 0x5c5   :  { %1417 = vmatprep.subr.bf16.mxu0 %v1625_v0 }
 0x5cb   :  { %1408 = vmatmul.mubr.msk.bf16.vlgmr.msra.gmra.mrb[20].mxu0 %vm168_vm2, %v385_v5 }
 0x5cc   :  { %1419 = vmatprep.mubr.msk.bf16.mxu0 %vm1626_vm0, %v1625_v0 }
 0x5cd   :  { %1418 = vmatpush3.bf16.xpose.msra.mxu0 %v761_v55 }
 0x5ce   :  { %1429 = vmatprep.subr.bf16.mxu0 %v1625_v0 }
 0x5d4   :  { %1420 = vmatmul.mubr.msk.bf16.vlgmr.msra.gmra.mrb[24].mxu0 %vm168_vm2, %v754_v56  ;;  %v163_v56 = vld [vmem:[#allocation7 + $0x8] sm:$0xf] }
 0x5d5   :  { %1431 = vmatprep.mubr.msk.bf16.mxu0 %vm1626_vm0, %v1625_v0 }
 0x692   :  { %v554_v57 = vpop.f32.mrb[12].mxu1 }
 0x693   :  { %v1391_v58 = vpop.f32.mrb[13].mxu1 }
 0x694   :  { %v557_v59 = vpop.f32.mrb[14].mxu1 }
 0x695   :  { %v1392_v60 = vpop.f32.mrb[15].mxu1 }
 0x696   :  { %v602_v61 = vpop.f32.mrb[16].mxu0 }
 0x697   :  { %v608_v62 = vpack.c.bf16 %v602_v61, %v554_v57  ;;  %v1397_v63 = vpop.f32.mrb[17].mxu0  ;;  %v928_v57 = vsel %vm293_vm3, %v163_v56, 0 }
 0x698   :  { %v605_v1 = vpop.f32.mrb[18].mxu0 }
 0x699   :  { %v1398_v3 = vpop.f32.mrb[19].mxu0  ;;  %1402 = vmatmul.mubr.msk.bf16.vlgmr.msra.gmra.mrb[16].mxu1 %vm168_vm2, %v608_v62 }
 0x69a   :  { %1412 = vmatpush3.bf16.xpose.msra.mxu1 %v711_v2  ;;  %1413 = vmatprep.mubr.msk.bf16.mxu1 %vm1626_vm0, %v1625_v0 }
 0x69b   :  { %1423 = vmatprep.subr.bf16.mxu1 %v1625_v0 }
 0x69e   :  { %v696_v4 = vpop.f32.mrb[20].mxu0 }
 0x69f   :  { %v1409_v5 = vpop.f32.mrb[21].mxu0 }
 0x6a0   :  { %v699_v7 = vpop.f32.mrb[22].mxu0 }
 0x6a1   :  { %v1410_v8 = vpop.f32.mrb[23].mxu0  ;;  %1414 = vmatmul.mubr.msk.bf16.vlgmr.msra.gmra.mrb[20].mxu1 %vm168_vm2, %v704_v6 }
 0x6a2   :  { %1425 = vmatprep.mubr.msk.bf16.mxu1 %vm1626_vm0, %v1625_v0 }
 0x6a7   :  { %v797_v10 = vpop.f32.mrb[24].mxu0 }
 0x6a8   :  { %v798_v11 = vadd.f32 %v1772_v26, %v797_v10  ;;  %v1421_v13 = vpop.f32.mrb[25].mxu0 }
 0x6a9   :  { %v800_v14 = vpop.f32.mrb[26].mxu0 }
 0x6aa   :  { %v1422_v15 = vpop.f32.mrb[27].mxu0  ;;  %v806_v16 = vsel %vm168_vm2, %v798_v11, -inf }
 0x6ab   :  { %807 = vmax.xlane.f32.xlu1 %v806_v16 }
 0x6bc   :  { %827 = vrot.lane.b32.xlu1 %v1741_v9, %s1633_s18 }
 0x6c0   :  { %975 = vrot.lane.b32.xlu1 %v1741_v9, %s1634_s19 }
 0x6c4   :  { %1025 = vrot.lane.b32.xlu1 %v1744_v12, %s1634_s19 }
 0x6c8   :  { %1023 = vrot.lane.b32.xlu1 %v1757_v20, %s1635_s20 }
 0x738   :  { %v808_v17 = vpop.xlane.xlu1 %807 }
 0x739   :  { %v810_v23 = vsub.f32 %v798_v11, %v808_v17 }
 0x73b   :  { %v813_v24 = vmul.f32 1.442695, %v810_v23 }
 0x73c   :  { %v828_v19 = vpop.permute.xlu1 %827 }
 0x73d   :  { %v833_v22 = vsel %vm293_vm3, %v828_v19, 0  ;;  %1510 = vpow2.f32 %v813_v24 }
 0x73e   :  { %1424 = vmatpush3.bf16.msra.mxu1 %v833_v22 }
 0x73f   :  { %1435 = vmatprep.subr.bf16.mxu1 %v1625_v0 }
 0x747   :  { %v1511_v37 = vpop.eup %1510 }
 0x748   :  { %v818_v38 = vsel %vm168_vm2, %v1511_v37, 0.0 }
 0x76c   :  { %v649_v25 = vpop.f32.mrb[16].mxu1 }
 0x76d   :  { %v1868_v27 = vadd.f32 %v696_v4, %v649_v25  ;;  %v1403_v28 = vpop.f32.mrb[17].mxu1 }
 0x76e   :  { %v652_v29 = vpop.f32.mrb[18].mxu1 }
 0x76f   :  { %v1870_v30 = vadd.f32 %v699_v7, %v652_v29  ;;  %v1404_v31 = vpop.f32.mrb[19].mxu1 }
 0x774   :  { %v747_v32 = vpop.f32.mrb[20].mxu1 }
 0x775   :  { %v748_v20 = vadd.f32 %v1766_v21, %v747_v32  ;;  %v1415_v33 = vpop.f32.mrb[21].mxu1 }
 0x776   :  { %v750_v34 = vpop.f32.mrb[22].mxu1 }
 0x777   :  { %v1416_v35 = vpop.f32.mrb[23].mxu1  ;;  %v803_v36 = vsel %vm168_vm2, %v748_v20, -inf }
 0x778   :  { %804 = vmax.xlane.f32.xlu0 %v803_v36 }
 0x77c   :  { %819 = vadd.xlane.f32.xlu0 %v818_v38 }
 0x805   :  { %v805_v39 = vpop.xlane.xlu0 %804 }
 0x806   :  { %v809_v40 = vsub.f32 %v748_v20, %v805_v39 }
 0x808   :  { %v811_v41 = vmul.f32 1.442695, %v809_v40 }
 0x809   :  { %v820_v44 = vpop.xlane.xlu0 %819 }
 0x80a   :  { %1512 = vpow2.f32 %v811_v41 }
 0x80b   :  { %1514 = vrcp.f32 %v820_v44 }
 0x814   :  { %v1513_v42 = vpop.eup %1512 }
 0x815   :  { %v815_v43 = vsel %vm168_vm2, %v1513_v42, 0.0  ;;  %v1515_v45 = vpop.eup %1514 }
 0x816   :  { %816 = vadd.xlane.f32.xlu0 %v815_v43  ;;  %v824_v47 = vmul.f32 %v1515_v45, %v1511_v37  ;;  %v164_v43 = vld [vmem:[#allocation7 + $0xc] sm:$0xf] }
 0x817   :  { %v1198_v44 = vsel %vm293_vm3, %v164_v43, 0 }
 0x818   :  { %v826_v50 = vpack.c.bf16 %v824_v47, %v824_v47 }
 0x82c   :  { %875 = vrot.lane.b32.xlu0 %v1744_v12, %s1633_s18 }
 0x830   :  { %973 = vrot.lane.b32.xlu0 %v1750_v18, %s1635_s20  ;;  %v976_v18 = vpop.permute.xlu1 %975 }
 0x831   :  { %v981_v53 = vsel %vm168_vm2, %v976_v18, 0 }
 0x834   :  { %v1026_v62 = vpop.permute.xlu1 %1025 }
 0x835   :  { %v1031_v4 = vsel %vm168_vm2, %v1026_v62, 0 }
 0x838   :  { %v1024_v14 = vpop.permute.xlu1 %1023 }
 0x8a3   :  { %v817_v46 = vpop.xlane.xlu0 %816 }
 0x8a4   :  { %1516 = vrcp.f32 %v817_v46 }
 0x8a7   :  { %v876_v48 = vpop.permute.xlu0 %875 }
 0x8a8   :  { %v881_v49 = vsel %vm293_vm3, %v876_v48, 0 }
 0x8a9   :  { %1430 = vmatpush3.bf16.msra.mxu0 %v881_v49 }
 0x8aa   :  { %1441 = vmatprep.subr.bf16.mxu0 %v1625_v0 }
 0x8ab   :  { %v974_v55 = vpop.permute.xlu0 %973 }
 0x8ac   :  { %1432 = vmatmul.mubr.msk.bf16.vlgmr.msra.gmra.mrb[28].mxu0 %vm168_vm2, %v826_v50 }
 0x8ad   :  { %1443 = vmatprep.mubr.msk.bf16.mxu0 %vm1626_vm0, %v1625_v0 }
 0x8ae   :  { %v1517_v51 = vpop.eup %1516 }
 0x8af   :  { %v823_v52 = vmul.f32 %v1517_v51, %v1513_v42 }
 0x8b1   :  { %v825_v54 = vpack.c.bf16 %v823_v52, %v823_v52 }
 0x8b2   :  { %1442 = vmatpush3.bf16.xpose.msra.mxu0 %v981_v53 }
 0x8b3   :  { %1426 = vmatmul.mubr.msk.bf16.vlgmr.msra.gmra.mrb[24].mxu1 %vm168_vm2, %v825_v54  ;;  %1453 = vmatprep.subr.bf16.mxu0 %v1625_v0 }
 0x8b4   :  { %1437 = vmatprep.mubr.msk.bf16.mxu1 %vm1626_vm0, %v1625_v0  ;;  %1436 = vmatpush3.bf16.msra.mxu1 %v928_v57 }
 0x8b5   :  { %1447 = vmatprep.subr.bf16.mxu1 %v1625_v0 }
 0x8b9   :  { %1444 = vmatmul.mubr.msk.bf16.vlgmr.msra.gmra.mrb[32].mxu0 %vm168_vm2, %v974_v55 }
 0x8ba   :  { %1455 = vmatprep.mubr.msk.bf16.mxu0 %vm1626_vm0, %v1625_v0 }
 0x97f   :  { %v917_v58 = vpop.f32.mrb[28].mxu0 }
 0x980   :  { %v1433_v59 = vpop.f32.mrb[29].mxu0 }
 0x981   :  { %v920_v60 = vpop.f32.mrb[30].mxu0 }
 0x982   :  { %v1434_v61 = vpop.f32.mrb[31].mxu0 }
 0x986   :  { %v869_v63 = vpop.f32.mrb[24].mxu1 }
 0x987   :  { %v923_v1 = vpack.c.bf16 %v917_v58, %v869_v63  ;;  %v1427_v2 = vpop.f32.mrb[25].mxu1  ;;  %v1299_v58 = vld [vmem:[%s1944_s5] ss:$0 sm:$0xff] }
 0x988   :  { %v872_v3 = vpop.f32.mrb[26].mxu1 }
 0x989   :  { %v1428_v5 = vpop.f32.mrb[27].mxu1  ;;  %1438 = vmatmul.mubr.msk.bf16.vlgmr.msra.gmra.mrb[28].mxu1 %vm168_vm2, %v923_v1 }
 0x98a   :  { %1448 = vmatpush3.bf16.xpose.msra.mxu1 %v1031_v4  ;;  %1449 = vmatprep.mubr.msk.bf16.mxu1 %vm1626_vm0, %v1625_v0 }
 0x98b   :  { %1459 = vmatprep.subr.bf16.mxu1 %v1625_v0 }
 0x98c   :  { %v1017_v6 = vpop.f32.mrb[32].mxu0 }
 0x98d   :  { %v1018_v7 = vadd.f32 %v1766_v21, %v1017_v6  ;;  %v1445_v8 = vpop.f32.mrb[33].mxu0 }
 0x98e   :  { %v1020_v10 = vpop.f32.mrb[34].mxu0 }
 0x98f   :  { %v1446_v11 = vpop.f32.mrb[35].mxu0  ;;  %v1073_v13 = vsel %vm168_vm2, %v1018_v7, -inf }
 0x990   :  { %1074 = vmax.xlane.f32.xlu0 %v1073_v13 }
 0x991   :  { %1450 = vmatmul.mubr.msk.bf16.vlgmr.msra.gmra.mrb[32].mxu1 %vm168_vm2, %v1024_v14 }
 0x992   :  { %1461 = vmatprep.mubr.msk.bf16.mxu1 %vm1626_vm0, %v1625_v0 }
 0xa1d   :  { %v1075_v15 = vpop.xlane.xlu0 %1074 }
 0xa1e   :  { %v1079_v16 = vsub.f32 %v1018_v7, %v1075_v15 }
 0xa20   :  { %v1081_v17 = vmul.f32 1.442695, %v1079_v16 }
 0xa22   :  { %1518 = vpow2.f32 %v1081_v17 }
 0xa2c   :  { %v1519_v19 = vpop.eup %1518 }
 0xa2d   :  { %v1085_v22 = vsel %vm168_vm2, %v1519_v19, 0.0 }
 0xa2e   :  { %1086 = vadd.xlane.f32.xlu0 %v1085_v22 }
 0xa5c   :  { %v964_v21 = vpop.f32.mrb[28].mxu1 }
 0xa5d   :  { %v971_v23 = vadd.f32 %v964_v21, %v1868_v27  ;;  %v1439_v24 = vpop.f32.mrb[29].mxu1 }
 0xa5e   :  { %v967_v25 = vpop.f32.mrb[30].mxu1 }
 0xa5f   :  { %v972_v28 = vadd.f32 %v967_v25, %v1870_v30  ;;  %v1440_v29 = vpop.f32.mrb[31].mxu1 }
 0xa64   :  { %v1067_v31 = vpop.f32.mrb[32].mxu1 }
 0xa65   :  { %v1068_v32 = vadd.f32 %v1772_v26, %v1067_v31  ;;  %v1451_v20 = vpop.f32.mrb[33].mxu1 }
 0xa66   :  { %v1070_v33 = vpop.f32.mrb[34].mxu1 }
 0xa67   :  { %v1452_v34 = vpop.f32.mrb[35].mxu1  ;;  %v1076_v35 = vsel %vm168_vm2, %v1068_v32, -inf }
 0xa68   :  { %1077 = vmax.xlane.f32.xlu1 %v1076_v35 }
 0xa79   :  { %1097 = vrot.lane.b32.xlu1 %v1741_v9, %s1636_s2 }
 0xabb   :  { %v1087_v36 = vpop.xlane.xlu0 %1086 }
 0xabc   :  { %1520 = vrcp.f32 %v1087_v36 }
 0xac6   :  { %v1521_v27 = vpop.eup %1520 }
 0xac7   :  { %v1093_v39 = vmul.f32 %v1521_v27, %v1519_v19 }
 0xac9   :  { %v1095_v41 = vpack.c.bf16 %v1093_v39, %v1093_v39 }
 0xaf5   :  { %v1078_v37 = vpop.xlane.xlu1 %1077 }
 0xaf6   :  { %v1080_v38 = vsub.f32 %v1068_v32, %v1078_v37 }
 0xaf8   :  { %v1083_v30 = vmul.f32 1.442695, %v1080_v38 }
 0xaf9   :  { %v1098_v40 = vpop.permute.xlu1 %1097 }
 0xafa   :  { %1522 = vpow2.f32 %v1083_v30  ;;  %v1103_v26 = vsel %vm293_vm3, %v1098_v40, 0 }
 0xafb   :  { %1454 = vmatpush3.bf16.msra.mxu0 %v1103_v26 }
 0xafc   :  { %1465 = vmatprep.subr.bf16.mxu0 %v1625_v0 }
 0xafe   :  { %1456 = vmatmul.mubr.msk.bf16.vlgmr.msra.gmra.mrb[36].mxu0 %vm168_vm2, %v1095_v41 }
 0xaff   :  { %1467 = vmatprep.mubr.msk.bf16.mxu0 %vm1626_vm0, %v1625_v0  ;;  %1466 = vmatpush3.bf16.msra.mxu0 %v1198_v44 }
 0xb04   :  { %v1523_v9 = vpop.eup %1522 }
 0xb05   :  { %v1088_v42 = vsel %vm168_vm2, %v1523_v9, 0.0 }
 0xb06   :  { %1089 = vadd.xlane.f32.xlu0 %v1088_v42 }
 0xb1c   :  { %1145 = vrot.lane.b32.xlu0 %v1744_v12, %s1636_s2 }
 0xb93   :  { %v1090_v45 = vpop.xlane.xlu0 %1089 }
 0xb94   :  { %1524 = vrcp.f32 %v1090_v45 }
 0xb97   :  { %v1146_v46 = vpop.permute.xlu0 %1145 }
 0xb98   :  { %v1151_v47 = vsel %vm293_vm3, %v1146_v46, 0 }
 0xb99   :  { %1460 = vmatpush3.bf16.msra.mxu1 %v1151_v47 }
 0xb9e   :  { %v1525_v48 = vpop.eup %1524 }
 0xb9f   :  { %v1094_v49 = vmul.f32 %v1525_v48, %v1523_v9 }
 0xba1   :  { %v1096_v50 = vpack.c.bf16 %v1094_v49, %v1094_v49 }
 0xba3   :  { %1462 = vmatmul.mubr.msk.bf16.vlgmr.msra.gmra.mrb[36].mxu1 %vm168_vm2, %v1096_v50 }
 0xbd1   :  { %v1139_v0 = vpop.f32.mrb[36].mxu0 }
 0xbd2   :  { %v1457_v51 = vpop.f32.mrb[37].mxu0 }
 0xbd3   :  { %v1142_v18 = vpop.f32.mrb[38].mxu0 }
 0xbd4   :  { %v1458_v52 = vpop.f32.mrb[39].mxu0 }
 0xc76   :  { %v1187_v12 = vpop.f32.mrb[36].mxu1 }
 0xc77   :  { %v1193_v53 = vpack.c.bf16 %v1187_v12, %v1139_v0  ;;  %v1463_v54 = vpop.f32.mrb[37].mxu1 }
 0xc78   :  { %v1190_v55 = vpop.f32.mrb[38].mxu1 }
 0xc79   :  { %v1464_v56 = vpop.f32.mrb[39].mxu1  ;;  %1468 = vmatmul.mubr.msk.bf16.vlgmr.msra.gmra.mrb[40].mxu0 %vm168_vm2, %v1193_v53 }
 0xd4c   :  { %v1234_v57 = vpop.f32.mrb[40].mxu0 }
 0xd4d   :  { %v1241_v59 = vadd.f32 %v1234_v57, %v971_v23  ;;  %v1469_v60 = vpop.f32.mrb[41].mxu0 }
 0xd4e   :  { %v1237_v61 = vpop.f32.mrb[42].mxu0 }
 0xd4f   :  { %v1250_v62 = vadd.f32 %v1299_v58, %v1241_v59  ;;  %v1242_v63 = vadd.f32 %v1237_v61, %v972_v28  ;;  %v1470_v1 = vpop.f32.mrb[43].mxu0 }
 0xd51   :  { %1252 = vst.msk [vmem:[#allocation8] sm:$0xff] %vm96_vm1, %v1250_v62  ;;  %v1251_v2 = vadd.f32 %v1299_v58, %v1242_v63 }
 0xd53   :  { %1253 = vst.msk [vmem:[#allocation8 + $0x8] sm:$0xff] %vm96_vm1, %v1251_v2 }
 0xd54   :  { %1603 = shalt.err (!%p1600_p0)
}
 0xd55   :  { %s1604_s28 = scalar_lea.hbm %s1945_s6, 256 }
 0xd56   :  { %p1605_p1 = scmp.ne.s32.totalorder %s1945_s6, %s1604_s28  ;;  %p1608_p2 = scmp.lt.u32.totalorder %s1604_s28, %s1945_s6 }
 0xd58   :  { %p1610_p3 = pnand %p1608_p2, %p1605_p1 }
 0xd5a   :  { %1613 = shalt.err (!%p1610_p3)
}
 0xd5b   :  { %s1638_s0 = smov 128   ;;  %s1639_s24 = smov 8  }
 0xd5c   :  { %1265 = dma.vmem_to_hbm [thread:$0]  %s1260_s25, 256, %s1945_s6, [#allocation4], %s1638_s0, %s1638_s0, %s1639_s24  }
 0xd5d   :  { %1618 = dma.done.wait [#allocation4], 256  }
 0xd5e   :  { %1619 = vsyncadd [#allocation4], 4294967040 }
 0xd5f   :  { %1269 = vsyncpa [#allocation3], 1 }
 0xd60   :  { %1270 = vsyncpa [#allocation6], 1 }
 0xd61   :  { %1271 = vsyncpa [#allocation4], 1 }

</bundles_post_ra>
